<compile_context>
chip_gen: v7x
topology: tpu7x:2x2x1
jax: 0.10.0
libtpu: 0.0.40
codegen_flags: <defaults>
</compile_context>

<pallas_src>
import functools

import jax
import jax.numpy as jnp
from jax.experimental import pallas as pl
from jax.experimental.pallas import tpu as pltpu

IN_F, H1, H2, NCLS = 784, 500, 84, 10        # logical (PyTorch) dims
H1P, H2P, NCLSP = 512, 128, 128              # lane-padded dims
NEG_INF = -1e30                              # padded-class bias (keeps softmax exact)


def mlp_kernel(x_ref, w1_ref, w2_ref, w3_ref, bias_ref, o_ref):
    # x tile: (TILE_B, 784) bf16; weights bf16; bias packed f32 (1, 768).
    b1 = bias_ref[:, 0:H1P]                      # (1, 512)
    b2 = bias_ref[:, H1P:H1P + H2P]              # (1, 128)
    b3 = bias_ref[:, H1P + H2P:H1P + H2P + NCLSP]  # (1, 128), padded lanes = -1e30

    # fc1 + ReLU (bf16 MXU matmul, f32 accumulate, f32 elementwise)
    h1 = jnp.dot(x_ref[...], w1_ref[...], preferred_element_type=jnp.float32)
    h1 = jnp.maximum(h1 + b1, 0.0)

    # fc2 + ReLU
    h2 = jnp.dot(h1.astype(jnp.bfloat16), w2_ref[...],
                 preferred_element_type=jnp.float32)
    h2 = jnp.maximum(h2 + b2, 0.0)

    # fc3 (padded classes get -1e30 via the bias -> exp underflows to 0)
    logits = jnp.dot(h2.astype(jnp.bfloat16), w3_ref[...],
                     preferred_element_type=jnp.float32) + b3

    # log_softmax over the class (last) axis, in f32.
    m = jnp.max(logits, axis=-1, keepdims=True)
    shifted = logits - m
    lse = jnp.log(jnp.sum(jnp.exp(shifted), axis=-1, keepdims=True))
    o_ref[...] = (shifted - lse).astype(o_ref.dtype)


def _round_up(x, m):
    return (x + m - 1) // m * m


@functools.partial(jax.jit, static_argnames=("tile_b",))
def net_forward(x, packed_params, tile_b=256):
    """x: (B, 784) f32/bf16. Returns (B, 10) f32 log-probabilities."""
    w1, w2, w3, bias = packed_params
    B = x.shape[0]
    # TILE_B: 256-multiples are ideal on v6e/v7x (2x256 MXU), 128 on v5e; for
    # tiny batches just round the batch up to a sublane multiple.
    tb = min(tile_b, _round_up(B, 8))
    b_pad = _round_up(B, tb)
    if b_pad != B:
        x = jnp.pad(x, ((0, b_pad - B), (0, 0)))
    x = x.astype(jnp.bfloat16)

    out = pl.pallas_call(
        mlp_kernel,
        out_shape=jax.ShapeDtypeStruct((b_pad, NCLSP), jnp.float32),
        grid=(b_pad // tb,),
        in_specs=[
            pl.BlockSpec((tb, IN_F), lambda i: (i, 0)),        # x tile (pipelined)
            pl.BlockSpec((IN_F, H1P), lambda i: (0, 0)),       # w1, VMEM-resident
            pl.BlockSpec((H1P, H2P), lambda i: (0, 0)),        # w2, VMEM-resident
            pl.BlockSpec((H2P, NCLSP), lambda i: (0, 0)),      # w3, VMEM-resident
            pl.BlockSpec((1, H1P + H2P + NCLSP), lambda i: (0, 0)),  # packed biases
        ],
        out_specs=pl.BlockSpec((tb, NCLSP), lambda i: (i, 0)),
        compiler_params=pltpu.CompilerParams(
            dimension_semantics=("parallel",),  # shard batch tiles across TCs (v7x)
        ),
    )(x, w1, w2, w3, bias)
    return out[:B, :NCLS]


def init_params(key):
    # Deterministic synthetic init mirroring nn.Linear (stored as [in, out]).
    k1, k2, k3, k4, k5, k6 = jax.random.split(key, 6)

    def lin(kw, kb, fan_in, fan_out):
        bound = 1.0 / jnp.sqrt(fan_in)
        w = jax.random.uniform(kw, (fan_in, fan_out), jnp.float32, -bound, bound)
        b = jax.random.uniform(kb, (1, fan_out), jnp.float32, -bound, bound)
        return w, b

    w1, b1 = lin(k1, k2, IN_F, H1)
    w2, b2 = lin(k3, k4, H1, H2)
    w3, b3 = lin(k5, k6, H2, NCLS)
    return (w1, b1, w2, b2, w3, b3)


def pack_params(params):
    """Host-side prep: lane-pad, cast weights to bf16, pack biases (f32)."""
    w1, b1, w2, b2, w3, b3 = params
    w1p = jnp.zeros((IN_F, H1P), jnp.float32).at[:, :H1].set(w1).astype(jnp.bfloat16)
    w2p = jnp.zeros((H1P, H2P), jnp.float32).at[:H1, :H2].set(w2).astype(jnp.bfloat16)
    w3p = jnp.zeros((H2P, NCLSP), jnp.float32).at[:H2, :NCLS].set(w3).astype(jnp.bfloat16)
    b1p = jnp.zeros((1, H1P), jnp.float32).at[:, :H1].set(b1)
    b2p = jnp.zeros((1, H2P), jnp.float32).at[:, :H2].set(b2)
    # Padded class lanes get a huge negative bias so log_softmax ignores them.
    b3p = jnp.full((1, NCLSP), NEG_INF, jnp.float32).at[:, :NCLS].set(b3)
    bias = jnp.concatenate([b1p, b2p, b3p], axis=1)  # (1, 768)
    return (w1p, w2p, w3p, bias)


def reference(x, packed_params):
    # Plain-JAX reference using the same bf16-rounded operands + f32 accumulation.
    w1, w2, w3, bias = packed_params
    b1 = bias[:, :H1P]
    b2 = bias[:, H1P:H1P + H2P]
    b3 = bias[:, H1P + H2P:]
    xf = x.astype(jnp.bfloat16).astype(jnp.float32)
    h1 = jnp.maximum(xf @ w1.astype(jnp.float32) + b1, 0.0)
    h2 = jnp.maximum(h1.astype(jnp.bfloat16).astype(jnp.float32)
                     @ w2.astype(jnp.float32) + b2, 0.0)
    logits = (h2.astype(jnp.bfloat16).astype(jnp.float32)
              @ w3.astype(jnp.float32) + b3)
    return jax.nn.log_softmax(logits[:, :NCLS], axis=-1)


if __name__ == "__main__":
    key = jax.random.PRNGKey(0)
    kp, kx = jax.random.split(key)
    params = init_params(kp)
    packed = pack_params(params)

    B = 8
    x = jax.random.normal(kx, (B, IN_F), jnp.float32)

    out = net_forward(x, packed)
    out = jax.block_until_ready(out)

    ref = reference(x, packed)
    assert out.shape == (B, NCLS)
    assert bool(jnp.all(jnp.isfinite(out)))
    assert jnp.allclose(out, ref, atol=1e-3, rtol=1e-3), (
        f"max abs err {float(jnp.max(jnp.abs(out - ref)))}")

    print("KERNEL_OK")
</pallas_src>

<mosaic_0001>
module attributes {stable_mosaic.version = 11 : i64} {
  func.func @mlp_kernel(%arg0: i32, %arg1: memref<8x784xbf16, #tpu.memory_space<vmem>>, %arg2: memref<784x512xbf16, #tpu.memory_space<vmem>>, %arg3: memref<512x128xbf16, #tpu.memory_space<vmem>>, %arg4: memref<128x128xbf16, #tpu.memory_space<vmem>>, %arg5: memref<1x768xf32, #tpu.memory_space<vmem>>, %arg6: memref<8x128xf32, #tpu.memory_space<vmem>>) attributes {dimension_semantics = [#tpu.dimension_semantics<parallel>], iteration_bounds = array<i64: 1>, scalar_prefetch = 0 : i64, scratch_operands = 0 : i64, tpu.core_type = #tpu.core_type<tc>, window_params = [{transform_indices = @transform_0, window_bounds = array<i64: 8, 784>}, {pipeline_mode = #tpu.pipeline_mode<synchronous>, transform_indices = @transform_1, window_bounds = array<i64: 784, 512>}, {pipeline_mode = #tpu.pipeline_mode<synchronous>, transform_indices = @transform_2, window_bounds = array<i64: 512, 128>}, {pipeline_mode = #tpu.pipeline_mode<synchronous>, transform_indices = @transform_3, window_bounds = array<i64: 128, 128>}, {pipeline_mode = #tpu.pipeline_mode<synchronous>, transform_indices = @transform_4, window_bounds = array<i64: 1, 768>}, {transform_indices = @transform_5, window_bounds = array<i64: 8, 128>}]} {
    %c0 = arith.constant 0 : index
    %c0_0 = arith.constant 0 : index
    %0 = vector.load %arg5[%c0, %c0_0] : memref<1x768xf32, #tpu.memory_space<vmem>>, vector<1x512xf32>
    %c0_1 = arith.constant 0 : index
    %c512 = arith.constant 512 : index
    %1 = vector.load %arg5[%c0_1, %c512] : memref<1x768xf32, #tpu.memory_space<vmem>>, vector<1x128xf32>
    %c0_2 = arith.constant 0 : index
    %c640 = arith.constant 640 : index
    %2 = vector.load %arg5[%c0_2, %c640] : memref<1x768xf32, #tpu.memory_space<vmem>>, vector<1x128xf32>
    %c0_3 = arith.constant 0 : index
    %c0_4 = arith.constant 0 : index
    %3 = vector.load %arg1[%c0_3, %c0_4] : memref<8x784xbf16, #tpu.memory_space<vmem>>, vector<8x784xbf16>
    %c0_5 = arith.constant 0 : index
    %c0_6 = arith.constant 0 : index
    %4 = vector.load %arg2[%c0_5, %c0_6] : memref<784x512xbf16, #tpu.memory_space<vmem>>, vector<784x512xbf16>
    %cst = arith.constant dense<0.000000e+00> : vector<8x512xf32>
    %5 = tpu.matmul %3, %4, %cst {dimension_numbers = #tpu.dot_dimension_numbers<[1], [0], [0], [1], [0, 0, 1, 1], [], []>} : vector<8x784xbf16>, vector<784x512xbf16>, vector<8x512xf32> -> vector<8x512xf32>
    %6 = vector.broadcast %0 : vector<1x512xf32> to vector<8x512xf32>
    %7 = arith.addf %5, %6 : vector<8x512xf32>
    %cst_7 = arith.constant 0.000000e+00 : f32
    %8 = vector.broadcast %cst_7 : f32 to vector<8x512xf32>
    %9 = arith.maximumf %7, %8 : vector<8x512xf32>
    %10 = arith.truncf %9 : vector<8x512xf32> to vector<8x512xbf16>
    %c0_8 = arith.constant 0 : index
    %c0_9 = arith.constant 0 : index
    %11 = vector.load %arg3[%c0_8, %c0_9] : memref<512x128xbf16, #tpu.memory_space<vmem>>, vector<512x128xbf16>
    %cst_10 = arith.constant dense<0.000000e+00> : vector<8x128xf32>
    %12 = tpu.matmul %10, %11, %cst_10 {dimension_numbers = #tpu.dot_dimension_numbers<[1], [0], [0], [1], [0, 0, 1, 1], [], []>} : vector<8x512xbf16>, vector<512x128xbf16>, vector<8x128xf32> -> vector<8x128xf32>
    %13 = vector.broadcast %1 : vector<1x128xf32> to vector<8x128xf32>
    %14 = arith.addf %12, %13 : vector<8x128xf32>
    %cst_11 = arith.constant 0.000000e+00 : f32
    %15 = vector.broadcast %cst_11 : f32 to vector<8x128xf32>
    %16 = arith.maximumf %14, %15 : vector<8x128xf32>
    %17 = arith.truncf %16 : vector<8x128xf32> to vector<8x128xbf16>
    %c0_12 = arith.constant 0 : index
    %c0_13 = arith.constant 0 : index
    %18 = vector.load %arg4[%c0_12, %c0_13] : memref<128x128xbf16, #tpu.memory_space<vmem>>, vector<128x128xbf16>
    %cst_14 = arith.constant dense<0.000000e+00> : vector<8x128xf32>
    %19 = tpu.matmul %17, %18, %cst_14 {dimension_numbers = #tpu.dot_dimension_numbers<[1], [0], [0], [1], [0, 0, 1, 1], [], []>} : vector<8x128xbf16>, vector<128x128xbf16>, vector<8x128xf32> -> vector<8x128xf32>
    %20 = vector.broadcast %2 : vector<1x128xf32> to vector<8x128xf32>
    %21 = arith.addf %19, %20 : vector<8x128xf32>
    %cst_15 = arith.constant dense<0xFF800000> : vector<8xf32>
    %22 = vector.multi_reduction <maximumf>, %21, %cst_15 [1] : vector<8x128xf32> to vector<8xf32>
    %23 = vector.shape_cast %22 : vector<8xf32> to vector<8x1xf32>
    %24 = vector.broadcast %23 : vector<8x1xf32> to vector<8x128xf32>
    %25 = arith.subf %21, %24 : vector<8x128xf32>
    %26 = math.exp %25 : vector<8x128xf32>
    %cst_16 = arith.constant dense<0.000000e+00> : vector<8xf32>
    %27 = vector.multi_reduction <add>, %26, %cst_16 [1] : vector<8x128xf32> to vector<8xf32>
    %28 = vector.shape_cast %27 : vector<8xf32> to vector<8x1xf32>
    %29 = math.log %28 : vector<8x1xf32>
    %30 = vector.broadcast %29 : vector<8x1xf32> to vector<8x128xf32>
    %31 = arith.subf %25, %30 : vector<8x128xf32>
    %c0_17 = arith.constant 0 : index
    %c0_18 = arith.constant 0 : index
    %32 = vector.load %arg6[%c0_17, %c0_18] : memref<8x128xf32, #tpu.memory_space<vmem>>, vector<8x128xf32>
    tpu.vector_store %arg6[%c0_17, %c0_18], %31 {strides = array<i32>} : memref<8x128xf32, #tpu.memory_space<vmem>>, vector<8x128xf32>,
    return
  }
  func.func @transform_0(%arg0: i32) -> (i32, i32) {
    %c0_i32 = arith.constant 0 : i32
    %c0_i32_0 = arith.constant 0 : i32
    return %arg0, %c0_i32 : i32, i32
  }
  func.func @transform_1(%arg0: i32) -> (i32, i32) {
    %c0_i32 = arith.constant 0 : i32
    %c0_i32_0 = arith.constant 0 : i32
    %c0_i32_1 = arith.constant 0 : i32
    return %c0_i32, %c0_i32_0 : i32, i32
  }
  func.func @transform_2(%arg0: i32) -> (i32, i32) {
    %c0_i32 = arith.constant 0 : i32
    %c0_i32_0 = arith.constant 0 : i32
    %c0_i32_1 = arith.constant 0 : i32
    return %c0_i32, %c0_i32_0 : i32, i32
  }
  func.func @transform_3(%arg0: i32) -> (i32, i32) {
    %c0_i32 = arith.constant 0 : i32
    %c0_i32_0 = arith.constant 0 : i32
    %c0_i32_1 = arith.constant 0 : i32
    return %c0_i32, %c0_i32_0 : i32, i32
  }
  func.func @transform_4(%arg0: i32) -> (i32, i32) {
    %c0_i32 = arith.constant 0 : i32
    %c0_i32_0 = arith.constant 0 : i32
    %c0_i32_1 = arith.constant 0 : i32
    return %c0_i32, %c0_i32_0 : i32, i32
  }
  func.func @transform_5(%arg0: i32) -> (i32, i32) {
    %c0_i32 = arith.constant 0 : i32
    %c0_i32_0 = arith.constant 0 : i32
    return %arg0, %c0_i32 : i32, i32
  }
}

</mosaic_0001>

<bundles_post_ra>
// kernel: net_forward.1
= control target key start
LH: loop header
LB: loop body
LE: loop exit
PB: predicated region body
PF: predicated region fallthrough
CT: control target
= control target key end

     0   :  { %10 = vsyncpa [#allocation3], 0  ;;  %s3022_s0 = inlined_call_operand.vmem [shape: bf16[8,784], index: 0, kind: input, shape index: {}]   ;;  %s3023_s1 = inlined_call_operand.hbm [shape: bf16[784,512], index: 1, kind: input, shape index: {}]   ;;  %s3024_s2 = inlined_call_operand.hbm [shape: bf16[512,128], index: 2, kind: input, shape index: {}]   ;;  %s3025_s3 = inlined_call_operand.vmem [shape: bf16[128,128], index: 3, kind: input, shape index: {}]   ;;  %s3026_s4 = inlined_call_operand.vmem [shape: f32[1,768], index: 4, kind: input, shape index: {}]   ;;  %s3027_s5 = inlined_call_operand.hbm [shape: f32[8,128], index: 5, kind: output, shape index: {}]  }
   0x1   :  { %11 = vsyncpa [#allocation6], 0 }
   0x2   :  { %12 = vsyncpa [#allocation4], 0  ;;  %s2873_s18 = smov [#allocation2]   ;;  %s2801_s22 = scalar_lea.hbm %s3023_s1, 25088 }
   0x3   :  { %s20_s19 = sshll.u32 %s2873_s18, 4  ;;  %p2802_p0 = scmp.ne.s32.totalorder %s3023_s1, %s2801_s22  ;;  %s21_s19 = int_to_ptr.vmem [resolvable:$true] %s20_s19 }
   0x4   :  { %p2805_p1 = scmp.lt.u32.totalorder %s2801_s22, %s3023_s1 }
   0x6   :  { %p2807_p2 = pnand %p2805_p1, %p2802_p0 }
   0x8   :  { %2810 = shalt.err (!%p2807_p2)
}
   0x9   :  { %s2811_s27 = scalar_lea.vmem %s21_s19, 25088  ;;  %p2816_p4 = scmp.lt.s32.totalorder %s21_s19, %s21_s19 }
   0xa   :  { %p2812_p3 = scmp.ne.s32.totalorder %s21_s19, %s2811_s27  ;;  %p2817_p5 = scmp.lt.s32.totalorder %s2811_s27, %s2811_s27 }
   0xc   :  { %p2818_p6 = por %p2817_p5, %p2816_p4 }
   0xe   :  { %p2819_p7 = pnand %p2818_p6, %p2812_p3 }
  0x10   :  { %2822 = shalt.err (!%p2819_p7)
}
  0x11   :  { %s2874_s28 = smov 256   ;;  %s2875_s29 = smov 16  }
  0x12   :  { %26 = dma.hbm_to_vmem [thread:$0]  %s3023_s1, 25088, %s21_s19, [#allocation3], %s2874_s28, %s2874_s28, %s2875_s29  }
  0x13   :  { %s2876_s7 = smov [#allocation5]   ;;  %s2823_s11 = scalar_lea.hbm %s3024_s2, 4096 }
  0x14   :  { %s32_s8 = sshll.u32 %s2876_s7, 4  ;;  %p2824_p8 = scmp.ne.s32.totalorder %s3024_s2, %s2823_s11  ;;  %s33_s8 = int_to_ptr.vmem [resolvable:$true] %s32_s8 }
  0x15   :  { %p2827_p9 = scmp.lt.u32.totalorder %s2823_s11, %s3024_s2 }
  0x17   :  { %p2829_p10 = pnand %p2827_p9, %p2824_p8 }
  0x19   :  { %2832 = shalt.err (!%p2829_p10)
}
  0x1a   :  { %s2833_s16 = scalar_lea.vmem %s33_s8, 4096  ;;  %p2838_p12 = scmp.lt.s32.totalorder %s33_s8, %s33_s8 }
  0x1b   :  { %p2834_p11 = scmp.ne.s32.totalorder %s33_s8, %s2833_s16  ;;  %p2839_p13 = scmp.lt.s32.totalorder %s2833_s16, %s2833_s16 }
  0x1d   :  { %p2840_p0 = por %p2839_p13, %p2838_p12 }
  0x1f   :  { %p2841_p1 = pnand %p2840_p0, %p2834_p11 }
  0x21   :  { %2844 = shalt.err (!%p2841_p1)
}
  0x22   :  { %s2877_s1 = smov 64   ;;  %s2878_s17 = smov 4  }
  0x23   :  { %38 = dma.hbm_to_vmem [thread:$0]  %s3024_s2, 4096, %s33_s8, [#allocation6], %s2877_s1, %s2877_s1, %s2878_s17  }
  0x24   :  { %2867 = dma.done.wait [#allocation3], 25088  }
  0x25   :  { %2868 = vsyncadd [#allocation3], 4294942208 }
  0x26   :  { %2869 = dma.done.wait [#allocation6], 4096  }
  0x27   :  { %2870 = vsyncadd [#allocation6], 4294963200  ;;  %v2879_v0 = vmov 0   ;;  %v2455_v1 = vld [vmem:[#allocation2 + $0x4] ss:$16 sps:$4 sm:$0xff]   ;;  %vm1278_vm0 = vcmask 130048  }
  0x28   :  { %1437 = vmatprep.mubr.bf16.mxu1 %v2879_v0  ;;  %v2457_v2 = vld [vmem:[#allocation2 + $0x604] ss:$16 sps:$4 sm:$0xff]   ;;  %1282 = vmatprep.subr.bf16.mxu0 %v2455_v1  ;;  %v2459_v3 = vld [vmem:[#allocation2] ss:$16 sps:$4 sm:$0xff]   ;;  %v2463_v6 = vld [vmem:[%s3022_s0 + $0x18] ss:$0 sps:$4 sm:$0xff]  }
  0x29   :  { %v2460_v4 = vld [vmem:[#allocation2 + $0x600] ss:$16 sps:$4 sm:$0xff]   ;;  %1405 = vmatprep.subr.bf16.mxu1 %v2457_v2  ;;  %v2461_v5 = vld [vmem:[#allocation2 + $0x24] ss:$16 sps:$4 sm:$0xff]   ;;  %1283 = vmatpush1.bf16.msra.mxu0 %v2459_v3  ;;  %v2464_v7 = vld [vmem:[#allocation2 + $0x8] ss:$16 sps:$4 sm:$0xff]  }
  0x2a   :  { %1406 = vmatpush1.bf16.msra.mxu1 %v2460_v4  ;;  %1284 = vmatprep.subr.bf16.mxu0 %v2461_v5  ;;  %v2466_v8 = vld [vmem:[#allocation2 + $0xc] ss:$16 sps:$4 sm:$0xff]   ;;  %v2467_v9 = vld [vmem:[#allocation2 + $0x20] ss:$16 sps:$4 sm:$0xff]   ;;  %v2468_v10 = vld [vmem:[#allocation2 + $0x44] ss:$16 sps:$4 sm:$0xff]  }
  0x2b   :  { %1446 = vmatprep.subr.bf16.mxu1 %v2466_v8  ;;  %v2470_v11 = vld [vmem:[#allocation2 + $0x28] ss:$16 sps:$4 sm:$0xff]   ;;  %v2472_v12 = vld [vmem:[#allocation2 + $0x2c] ss:$16 sps:$4 sm:$0xff]   ;;  %v2473_v13 = vld [vmem:[#allocation2 + $0x40] ss:$16 sps:$4 sm:$0xff]  }
  0x2c   :  { %v2474_v14 = vld [vmem:[#allocation2 + $0x64] ss:$16 sps:$4 sm:$0xff]   ;;  %v2478_v15 = vld [vmem:[#allocation2 + $0x4c] ss:$16 sps:$4 sm:$0xff]   ;;  %v2476_v16 = vld [vmem:[#allocation2 + $0x48] ss:$16 sps:$4 sm:$0xff]  }
  0x2d   :  { %2302 = vmatmul.mubr.msk.bf16.vlgmr.msra.gmra.mrb[0].mxu1 %vm1278_vm0, %v2463_v6  ;;  %1285 = vmatpush1.bf16.msra.mxu0 %v2467_v9  ;;  %v2479_v17 = vld [vmem:[#allocation2 + $0x60] ss:$16 sps:$4 sm:$0xff]   ;;  %v2480_v18 = vld [vmem:[#allocation2 + $0x84] ss:$16 sps:$4 sm:$0xff]   ;;  %v2484_v19 = vld [vmem:[#allocation2 + $0x6c] ss:$16 sps:$4 sm:$0xff]  }
  0x2e   :  { %1447 = vmatpush1.bf16.msra.mxu1 %v2464_v7  ;;  %1286 = vmatprep.subr.bf16.mxu0 %v2468_v10  ;;  %v2482_v20 = vld [vmem:[#allocation2 + $0x68] ss:$16 sps:$4 sm:$0xff]   ;;  %v2485_v21 = vld [vmem:[#allocation2 + $0x80] ss:$16 sps:$4 sm:$0xff]   ;;  %v2486_v22 = vld [vmem:[#allocation2 + $0xa4] ss:$16 sps:$4 sm:$0xff]  }
  0x2f   :  { %1448 = vmatprep.subr.bf16.mxu1 %v2472_v12  ;;  %v2490_v23 = vld [vmem:[#allocation2 + $0x8c] ss:$16 sps:$4 sm:$0xff]   ;;  %v2488_v24 = vld [vmem:[#allocation2 + $0x88] ss:$16 sps:$4 sm:$0xff]   ;;  %v2491_v25 = vld [vmem:[#allocation2 + $0xa0] ss:$16 sps:$4 sm:$0xff]  }
  0x30   :  { %v2492_v26 = vld [vmem:[#allocation2 + $0xc4] ss:$16 sps:$4 sm:$0xff]   ;;  %v2496_v27 = vld [vmem:[#allocation2 + $0xac] ss:$16 sps:$4 sm:$0xff]   ;;  %v2494_v28 = vld [vmem:[#allocation2 + $0xa8] ss:$16 sps:$4 sm:$0xff]  }
  0x31   :  { %1287 = vmatpush1.bf16.msra.mxu0 %v2473_v13  ;;  %v2497_v29 = vld [vmem:[#allocation2 + $0xc0] ss:$16 sps:$4 sm:$0xff]   ;;  %v2498_v30 = vld [vmem:[#allocation2 + $0xe4] ss:$16 sps:$4 sm:$0xff]   ;;  %v2502_v31 = vld [vmem:[#allocation2 + $0xcc] ss:$16 sps:$4 sm:$0xff]  }
  0x32   :  { %1449 = vmatpush1.bf16.msra.mxu1 %v2470_v11  ;;  %1288 = vmatprep.subr.bf16.mxu0 %v2474_v14  ;;  %v2500_v32 = vld [vmem:[#allocation2 + $0xc8] ss:$16 sps:$4 sm:$0xff]   ;;  %v2503_v33 = vld [vmem:[#allocation2 + $0xe0] ss:$16 sps:$4 sm:$0xff]   ;;  %v2504_v34 = vld [vmem:[#allocation2 + $0x104] ss:$16 sps:$4 sm:$0xff]  }
  0x33   :  { %1450 = vmatprep.subr.bf16.mxu1 %v2478_v15  ;;  %v2508_v35 = vld [vmem:[#allocation2 + $0xec] ss:$16 sps:$4 sm:$0xff]   ;;  %v2506_v36 = vld [vmem:[#allocation2 + $0xe8] ss:$16 sps:$4 sm:$0xff]   ;;  %v2509_v37 = vld [vmem:[#allocation2 + $0x100] ss:$16 sps:$4 sm:$0xff]  }
  0x34   :  { %v2510_v38 = vld [vmem:[#allocation2 + $0x124] ss:$16 sps:$4 sm:$0xff]   ;;  %v2514_v39 = vld [vmem:[#allocation2 + $0x10c] ss:$16 sps:$4 sm:$0xff]   ;;  %v2512_v40 = vld [vmem:[#allocation2 + $0x108] ss:$16 sps:$4 sm:$0xff]  }
  0x35   :  { %1289 = vmatpush1.bf16.msra.mxu0 %v2479_v17  ;;  %v2515_v41 = vld [vmem:[#allocation2 + $0x120] ss:$16 sps:$4 sm:$0xff]   ;;  %v2516_v42 = vld [vmem:[#allocation2 + $0x144] ss:$16 sps:$4 sm:$0xff]   ;;  %v2520_v43 = vld [vmem:[#allocation2 + $0x12c] ss:$16 sps:$4 sm:$0xff]  }
  0x36   :  { %1451 = vmatpush1.bf16.msra.mxu1 %v2476_v16  ;;  %1290 = vmatprep.subr.bf16.mxu0 %v2480_v18  ;;  %v2518_v44 = vld [vmem:[#allocation2 + $0x128] ss:$16 sps:$4 sm:$0xff]   ;;  %v2521_v45 = vld [vmem:[#allocation2 + $0x140] ss:$16 sps:$4 sm:$0xff]   ;;  %v2522_v46 = vld [vmem:[#allocation2 + $0x164] ss:$16 sps:$4 sm:$0xff]  }
  0x37   :  { %1452 = vmatprep.subr.bf16.mxu1 %v2484_v19  ;;  %v2526_v47 = vld [vmem:[#allocation2 + $0x14c] ss:$16 sps:$4 sm:$0xff]   ;;  %v2524_v48 = vld [vmem:[#allocation2 + $0x148] ss:$16 sps:$4 sm:$0xff]   ;;  %v53_v49 = vld [vmem:[%s3022_s0] sm:$0xff]  ;;  %vm2881_vm1 = vmmov 0  }
  0x38   :  { %v2527_v50 = vld [vmem:[#allocation2 + $0x160] ss:$16 sps:$4 sm:$0xff]   ;;  %v2528_v51 = vld [vmem:[#allocation2 + $0x184] ss:$16 sps:$4 sm:$0xff]   ;;  %v2100_v52 = vcombine.high %v53_v49, %v53_v49  ;;  %v2532_v53 = vld [vmem:[#allocation2 + $0x16c] ss:$16 sps:$4 sm:$0xff]   ;;  %v2099_v7 = vcombine.low %v53_v49, %v53_v49 }
  0x39   :  { %1291 = vmatpush1.bf16.msra.mxu0 %v2485_v21  ;;  %v2530_v54 = vld [vmem:[#allocation2 + $0x168] ss:$16 sps:$4 sm:$0xff]   ;;  %v2533_v55 = vld [vmem:[#allocation2 + $0x180] ss:$16 sps:$4 sm:$0xff]   ;;  %v2534_v56 = vld [vmem:[#allocation2 + $0x1a4] ss:$16 sps:$4 sm:$0xff]  }
  0x3a   :  { %1453 = vmatpush1.bf16.msra.mxu1 %v2482_v20  ;;  %1292 = vmatprep.subr.bf16.mxu0 %v2486_v22  ;;  %v2538_v57 = vld [vmem:[#allocation2 + $0x18c] ss:$16 sps:$4 sm:$0xff]   ;;  %v2536_v58 = vld [vmem:[#allocation2 + $0x188] ss:$16 sps:$4 sm:$0xff]   ;;  %v2539_v59 = vld [vmem:[#allocation2 + $0x1a0] ss:$16 sps:$4 sm:$0xff]  }
  0x3b   :  { %1454 = vmatprep.subr.bf16.mxu1 %v2490_v23  ;;  %1314 = vmatprep.mubr.bf16.mxu0 %v2100_v52  ;;  %v2540_v60 = vld [vmem:[#allocation2 + $0x1c4] ss:$16 sps:$4 sm:$0xff]   ;;  %v2544_v61 = vld [vmem:[#allocation2 + $0x1ac] ss:$16 sps:$4 sm:$0xff]   ;;  %v2542_v62 = vld [vmem:[#allocation2 + $0x1a8] ss:$16 sps:$4 sm:$0xff]  }
  0x3c   :  { %1478 = vmatprep.mubr.bf16.mxu1 %v2100_v52  ;;  %v2545_v63 = vld [vmem:[#allocation2 + $0x1c0] ss:$16 sps:$4 sm:$0xff]   ;;  %v2546_v1 = vld [vmem:[#allocation2 + $0x1e4] ss:$16 sps:$4 sm:$0xff]   ;;  %v2550_v2 = vld [vmem:[#allocation2 + $0x1cc] ss:$16 sps:$4 sm:$0xff]  }
  0x3d   :  { %1293 = vmatpush1.bf16.msra.mxu0 %v2491_v25  ;;  %v2548_v3 = vld [vmem:[#allocation2 + $0x1c8] ss:$16 sps:$4 sm:$0xff]   ;;  %v2551_v4 = vld [vmem:[#allocation2 + $0x1e0] ss:$16 sps:$4 sm:$0xff]   ;;  %v2556_v5 = vld [vmem:[#allocation2 + $0x204] ss:$16 sps:$4 sm:$0xff]  }
  0x3e   :  { %1455 = vmatpush1.bf16.msra.mxu1 %v2488_v24  ;;  %1294 = vmatprep.subr.bf16.mxu0 %v2492_v26  ;;  %v2559_v6 = vld [vmem:[#allocation2 + $0x1ec] ss:$16 sps:$4 sm:$0xff]   ;;  %v2554_v8 = vld [vmem:[#allocation2 + $0x200] ss:$16 sps:$4 sm:$0xff]   ;;  %v2557_v9 = vld [vmem:[#allocation2 + $0x1e8] ss:$16 sps:$4 sm:$0xff]  }
  0x3f   :  { %1456 = vmatprep.subr.bf16.mxu1 %v2496_v27  ;;  %v2562_v10 = vld [vmem:[#allocation2 + $0x224] ss:$16 sps:$4 sm:$0xff]   ;;  %v2565_v11 = vld [vmem:[#allocation2 + $0x20c] ss:$16 sps:$4 sm:$0xff]   ;;  %v2560_v12 = vld [vmem:[#allocation2 + $0x220] ss:$16 sps:$4 sm:$0xff]  }
  0x40   :  { %v2563_v13 = vld [vmem:[#allocation2 + $0x208] ss:$16 sps:$4 sm:$0xff]   ;;  %v2568_v14 = vld [vmem:[#allocation2 + $0x244] ss:$16 sps:$4 sm:$0xff]   ;;  %v2571_v15 = vld [vmem:[#allocation2 + $0x22c] ss:$16 sps:$4 sm:$0xff]  }
  0x41   :  { %1295 = vmatpush1.bf16.msra.mxu0 %v2497_v29  ;;  %v2566_v16 = vld [vmem:[#allocation2 + $0x240] ss:$16 sps:$4 sm:$0xff]   ;;  %v2569_v17 = vld [vmem:[#allocation2 + $0x228] ss:$16 sps:$4 sm:$0xff]   ;;  %v2574_v18 = vld [vmem:[#allocation2 + $0x264] ss:$16 sps:$4 sm:$0xff]  }
  0x42   :  { %1457 = vmatpush1.bf16.msra.mxu1 %v2494_v28  ;;  %1296 = vmatprep.subr.bf16.mxu0 %v2498_v30  ;;  %v2577_v19 = vld [vmem:[#allocation2 + $0x24c] ss:$16 sps:$4 sm:$0xff]   ;;  %v2572_v20 = vld [vmem:[#allocation2 + $0x260] ss:$16 sps:$4 sm:$0xff]   ;;  %v2575_v21 = vld [vmem:[#allocation2 + $0x248] ss:$16 sps:$4 sm:$0xff]  }
  0x43   :  { %1458 = vmatprep.subr.bf16.mxu1 %v2502_v31  ;;  %v2580_v22 = vld [vmem:[#allocation2 + $0x284] ss:$16 sps:$4 sm:$0xff]   ;;  %v2583_v23 = vld [vmem:[#allocation2 + $0x26c] ss:$16 sps:$4 sm:$0xff]   ;;  %v2578_v24 = vld [vmem:[#allocation2 + $0x280] ss:$16 sps:$4 sm:$0xff]  }
  0x44   :  { %v2581_v25 = vld [vmem:[#allocation2 + $0x268] ss:$16 sps:$4 sm:$0xff]   ;;  %v2586_v26 = vld [vmem:[#allocation2 + $0x2a4] ss:$16 sps:$4 sm:$0xff]   ;;  %v2589_v27 = vld [vmem:[#allocation2 + $0x28c] ss:$16 sps:$4 sm:$0xff]  }
  0x45   :  { %1297 = vmatpush1.bf16.msra.mxu0 %v2503_v33  ;;  %v2584_v28 = vld [vmem:[#allocation2 + $0x2a0] ss:$16 sps:$4 sm:$0xff]   ;;  %v2587_v29 = vld [vmem:[#allocation2 + $0x288] ss:$16 sps:$4 sm:$0xff]   ;;  %v2592_v30 = vld [vmem:[#allocation2 + $0x2c4] ss:$16 sps:$4 sm:$0xff]  }
  0x46   :  { %1459 = vmatpush1.bf16.msra.mxu1 %v2500_v32  ;;  %1298 = vmatprep.subr.bf16.mxu0 %v2504_v34  ;;  %v2595_v31 = vld [vmem:[#allocation2 + $0x2ac] ss:$16 sps:$4 sm:$0xff]   ;;  %v2590_v33 = vld [vmem:[#allocation2 + $0x2c0] ss:$16 sps:$4 sm:$0xff]   ;;  %v2593_v34 = vld [vmem:[#allocation2 + $0x2a8] ss:$16 sps:$4 sm:$0xff]  }
  0x47   :  { %1460 = vmatprep.subr.bf16.mxu1 %v2508_v35  ;;  %v2948_v32 = vld [vmem:[%s3022_s0 + $0x8] sm:$0xff]  ;;  %v2622_v52 = vld [vmem:[#allocation2 + $0x364] ss:$16 sps:$4 sm:$0xff]   ;;  %s2882_s22 = smov [#allocation7]  }
  0x48   :  { %v2102_v35 = vcombine.high %v2948_v32, %v2948_v32  ;;  %v2619_v49 = vld [vmem:[#allocation2 + $0x32c] ss:$16 sps:$4 sm:$0xff]   ;;  %s2089_s23 = sshll.u32 %s2882_s22, 4  ;;  %s2090_s23 = int_to_ptr.vmem [resolvable:$true] %s2089_s23 }
  0x49   :  { %1299 = vmatpush1.bf16.msra.mxu0 %v2509_v37  ;;  %v2601_v37 = vld [vmem:[#allocation2 + $0x2cc] ss:$16 sps:$4 sm:$0xff]   ;;  %p2850_p3 = scmp.lt.s32.totalorder %s2090_s23, %s2090_s23 }
  0x4a   :  { %1461 = vmatpush1.bf16.msra.mxu1 %v2506_v36  ;;  %1300 = vmatprep.subr.bf16.mxu0 %v2510_v38  ;;  %v2598_v36 = vld [vmem:[#allocation2 + $0x2e4] ss:$16 sps:$4 sm:$0xff]   ;;  %v2596_v38 = vld [vmem:[#allocation2 + $0x2e0] ss:$16 sps:$4 sm:$0xff]  }
  0x4b   :  { %1462 = vmatprep.subr.bf16.mxu1 %v2514_v39  ;;  %v2599_v39 = vld [vmem:[#allocation2 + $0x2c8] ss:$16 sps:$4 sm:$0xff]  }
  0x4d   :  { %1301 = vmatpush1.bf16.msra.mxu0 %v2515_v41  ;;  %v2607_v41 = vld [vmem:[#allocation2 + $0x2ec] ss:$16 sps:$4 sm:$0xff]  }
  0x4e   :  { %1463 = vmatpush1.bf16.msra.mxu1 %v2512_v40  ;;  %1302 = vmatprep.subr.bf16.mxu0 %v2516_v42  ;;  %v2604_v40 = vld [vmem:[#allocation2 + $0x304] ss:$16 sps:$4 sm:$0xff]   ;;  %v2602_v42 = vld [vmem:[#allocation2 + $0x300] ss:$16 sps:$4 sm:$0xff]  }
  0x4f   :  { %1464 = vmatprep.subr.bf16.mxu1 %v2520_v43  ;;  %v2605_v43 = vld [vmem:[#allocation2 + $0x2e8] ss:$16 sps:$4 sm:$0xff]  }
  0x51   :  { %1303 = vmatpush1.bf16.msra.mxu0 %v2521_v45  ;;  %v2613_v45 = vld [vmem:[#allocation2 + $0x30c] ss:$16 sps:$4 sm:$0xff]  }
  0x52   :  { %1465 = vmatpush1.bf16.msra.mxu1 %v2518_v44  ;;  %1304 = vmatprep.subr.bf16.mxu0 %v2522_v46  ;;  %v2610_v44 = vld [vmem:[#allocation2 + $0x324] ss:$16 sps:$4 sm:$0xff]   ;;  %v2608_v46 = vld [vmem:[#allocation2 + $0x320] ss:$16 sps:$4 sm:$0xff]  }
  0x53   :  { %1466 = vmatprep.subr.bf16.mxu1 %v2526_v47  ;;  %v2611_v47 = vld [vmem:[#allocation2 + $0x308] ss:$16 sps:$4 sm:$0xff]  }
  0x55   :  { %1305 = vmatpush1.bf16.msra.mxu0 %v2527_v50  ;;  %v2614_v50 = vld [vmem:[#allocation2 + $0x340] ss:$16 sps:$4 sm:$0xff]  }
  0x56   :  { %1467 = vmatpush1.bf16.msra.mxu1 %v2524_v48  ;;  %1306 = vmatprep.subr.bf16.mxu0 %v2528_v51  ;;  %v2616_v48 = vld [vmem:[#allocation2 + $0x344] ss:$16 sps:$4 sm:$0xff]   ;;  %v2617_v51 = vld [vmem:[#allocation2 + $0x328] ss:$16 sps:$4 sm:$0xff]  }
  0x57   :  { %1468 = vmatprep.subr.bf16.mxu1 %v2532_v53  ;;  %v2625_v53 = vld [vmem:[#allocation2 + $0x34c] ss:$16 sps:$4 sm:$0xff]  }
  0x59   :  { %1307 = vmatpush1.bf16.msra.mxu0 %v2533_v55  ;;  %v2623_v55 = vld [vmem:[#allocation2 + $0x348] ss:$16 sps:$4 sm:$0xff]  }
  0x5a   :  { %1469 = vmatpush1.bf16.msra.mxu1 %v2530_v54  ;;  %1308 = vmatprep.subr.bf16.mxu0 %v2534_v56  ;;  %v2620_v54 = vld [vmem:[#allocation2 + $0x360] ss:$16 sps:$4 sm:$0xff]   ;;  %v2628_v56 = vld [vmem:[#allocation2 + $0x384] ss:$16 sps:$4 sm:$0xff]  }
  0x5b   :  { %1470 = vmatprep.subr.bf16.mxu1 %v2538_v57  ;;  %v2631_v57 = vld [vmem:[#allocation2 + $0x36c] ss:$16 sps:$4 sm:$0xff]  }
  0x5d   :  { %1309 = vmatpush1.bf16.msra.mxu0 %v2539_v59  ;;  %v2629_v59 = vld [vmem:[#allocation2 + $0x368] ss:$16 sps:$4 sm:$0xff]  }
  0x5e   :  { %1471 = vmatpush1.bf16.msra.mxu1 %v2536_v58  ;;  %1310 = vmatprep.subr.bf16.mxu0 %v2540_v60  ;;  %v2626_v58 = vld [vmem:[#allocation2 + $0x380] ss:$16 sps:$4 sm:$0xff]   ;;  %v2634_v60 = vld [vmem:[#allocation2 + $0x3a4] ss:$16 sps:$4 sm:$0xff]  }
  0x5f   :  { %1472 = vmatprep.subr.bf16.mxu1 %v2544_v61  ;;  %v2637_v61 = vld [vmem:[#allocation2 + $0x38c] ss:$16 sps:$4 sm:$0xff]  }
  0x61   :  { %1311 = vmatpush1.bf16.msra.mxu0 %v2545_v63  ;;  %v2635_v63 = vld [vmem:[#allocation2 + $0x388] ss:$16 sps:$4 sm:$0xff]  }
  0x62   :  { %1473 = vmatpush1.bf16.msra.mxu1 %v2542_v62  ;;  %1312 = vmatprep.subr.bf16.mxu0 %v2546_v1  ;;  %v2632_v62 = vld [vmem:[#allocation2 + $0x3a0] ss:$16 sps:$4 sm:$0xff]   ;;  %v2640_v1 = vld [vmem:[#allocation2 + $0x3c4] ss:$16 sps:$4 sm:$0xff]  }
  0x63   :  { %1474 = vmatprep.subr.bf16.mxu1 %v2550_v2  ;;  %v2643_v2 = vld [vmem:[#allocation2 + $0x3ac] ss:$16 sps:$4 sm:$0xff]  }
  0x65   :  { %1313 = vmatpush1.bf16.msra.mxu0 %v2551_v4  ;;  %v2641_v4 = vld [vmem:[#allocation2 + $0x3a8] ss:$16 sps:$4 sm:$0xff]  }
  0x66   :  { %1475 = vmatpush1.bf16.msra.mxu1 %v2548_v3  ;;  %1323 = vmatprep.subr.bf16.mxu0 %v2556_v5  ;;  %v2638_v3 = vld [vmem:[#allocation2 + $0x3c0] ss:$16 sps:$4 sm:$0xff]   ;;  %v2646_v5 = vld [vmem:[#allocation2 + $0x3e4] ss:$16 sps:$4 sm:$0xff]  }
  0x67   :  { %1476 = vmatprep.subr.bf16.mxu1 %v2559_v6  ;;  %v2649_v6 = vld [vmem:[#allocation2 + $0x3cc] ss:$16 sps:$4 sm:$0xff]  }
  0x68   :  { %1315 = vmatmul.mubr.bf16.vlgmr.msra.gmra.mrb[0].mxu0 %v2099_v7 }
  0x69   :  { %1324 = vmatpush1.bf16.msra.mxu0 %v2554_v8  ;;  %1355 = vmatprep.mubr.bf16.mxu0 %v2102_v35  ;;  %v2647_v8 = vld [vmem:[#allocation2 + $0x3c8] ss:$16 sps:$4 sm:$0xff]  }
  0x6a   :  { %1477 = vmatpush1.bf16.msra.mxu1 %v2557_v9  ;;  %1325 = vmatprep.subr.bf16.mxu0 %v2562_v10  ;;  %v2654_v9 = vld [vmem:[#allocation2 + $0x404] ss:$16 sps:$4 sm:$0xff]   ;;  %v2657_v10 = vld [vmem:[#allocation2 + $0x3ec] ss:$16 sps:$4 sm:$0xff]  }
  0x6b   :  { %1487 = vmatprep.subr.bf16.mxu1 %v2565_v11  ;;  %v2101_v11 = vcombine.low %v2948_v32, %v2948_v32  ;;  %v2684_v32 = vld [vmem:[#allocation2 + $0x4a4] ss:$16 sps:$4 sm:$0xff]  }
  0x6d   :  { %1479 = vmatmul.mubr.bf16.vlgmr.msra.gmra.mrb[4].mxu1 %v2099_v7  ;;  %1326 = vmatpush1.bf16.msra.mxu0 %v2560_v12  ;;  %v2644_v7 = vld [vmem:[#allocation2 + $0x3e0] ss:$16 sps:$4 sm:$0xff]  }
  0x6e   :  { %1488 = vmatpush1.bf16.msra.mxu1 %v2563_v13  ;;  %1327 = vmatprep.subr.bf16.mxu0 %v2568_v14  ;;  %v2652_v12 = vld [vmem:[#allocation2 + $0x400] ss:$16 sps:$4 sm:$0xff]   ;;  %v2655_v13 = vld [vmem:[#allocation2 + $0x3e8] ss:$16 sps:$4 sm:$0xff]   ;;  %v2660_v14 = vld [vmem:[#allocation2 + $0x424] ss:$16 sps:$4 sm:$0xff]  }
  0x6f   :  { %1489 = vmatprep.subr.bf16.mxu1 %v2571_v15  ;;  %1519 = vmatprep.mubr.bf16.mxu1 %v2102_v35  ;;  %v2663_v15 = vld [vmem:[#allocation2 + $0x40c] ss:$16 sps:$4 sm:$0xff]   ;;  %v2685_v35 = vld [vmem:[#allocation2 + $0x488] ss:$16 sps:$4 sm:$0xff]  }
  0x71   :  { %1328 = vmatpush1.bf16.msra.mxu0 %v2566_v16  ;;  %v2957_v16 = vld [vmem:[%s3022_s0 + $0x10] sm:$0xff] }
  0x72   :  { %1490 = vmatpush1.bf16.msra.mxu1 %v2569_v17  ;;  %1329 = vmatprep.subr.bf16.mxu0 %v2574_v18  ;;  %v2658_v17 = vld [vmem:[#allocation2 + $0x420] ss:$16 sps:$4 sm:$0xff]   ;;  %v2104_v18 = vcombine.high %v2957_v16, %v2957_v16 }
  0x73   :  { %1491 = vmatprep.subr.bf16.mxu1 %v2577_v19  ;;  %v2661_v19 = vld [vmem:[#allocation2 + $0x408] ss:$16 sps:$4 sm:$0xff]  }
  0x75   :  { %1330 = vmatpush1.bf16.msra.mxu0 %v2572_v20  ;;  %v2666_v20 = vld [vmem:[#allocation2 + $0x444] ss:$16 sps:$4 sm:$0xff]  }
  0x76   :  { %1492 = vmatpush1.bf16.msra.mxu1 %v2575_v21  ;;  %1331 = vmatprep.subr.bf16.mxu0 %v2580_v22  ;;  %v2669_v21 = vld [vmem:[#allocation2 + $0x42c] ss:$16 sps:$4 sm:$0xff]   ;;  %v2664_v22 = vld [vmem:[#allocation2 + $0x440] ss:$16 sps:$4 sm:$0xff]  }
  0x77   :  { %1493 = vmatprep.subr.bf16.mxu1 %v2583_v23  ;;  %v2667_v23 = vld [vmem:[#allocation2 + $0x428] ss:$16 sps:$4 sm:$0xff]  }
  0x79   :  { %1332 = vmatpush1.bf16.msra.mxu0 %v2578_v24  ;;  %v2672_v24 = vld [vmem:[#allocation2 + $0x464] ss:$16 sps:$4 sm:$0xff]  }
  0x7a   :  { %1494 = vmatpush1.bf16.msra.mxu1 %v2581_v25  ;;  %1333 = vmatprep.subr.bf16.mxu0 %v2586_v26  ;;  %v2675_v25 = vld [vmem:[#allocation2 + $0x44c] ss:$16 sps:$4 sm:$0xff]   ;;  %v2670_v26 = vld [vmem:[#allocation2 + $0x460] ss:$16 sps:$4 sm:$0xff]  }
  0x7b   :  { %1495 = vmatprep.subr.bf16.mxu1 %v2589_v27  ;;  %v2673_v27 = vld [vmem:[#allocation2 + $0x448] ss:$16 sps:$4 sm:$0xff]  }
  0x7d   :  { %1334 = vmatpush1.bf16.msra.mxu0 %v2584_v28  ;;  %v2678_v28 = vld [vmem:[#allocation2 + $0x484] ss:$16 sps:$4 sm:$0xff]  }
  0x7e   :  { %1496 = vmatpush1.bf16.msra.mxu1 %v2587_v29  ;;  %1335 = vmatprep.subr.bf16.mxu0 %v2592_v30  ;;  %v2681_v29 = vld [vmem:[#allocation2 + $0x46c] ss:$16 sps:$4 sm:$0xff]   ;;  %v2676_v30 = vld [vmem:[#allocation2 + $0x480] ss:$16 sps:$4 sm:$0xff]  }
  0x7f   :  { %1497 = vmatprep.subr.bf16.mxu1 %v2595_v31  ;;  %v2679_v31 = vld [vmem:[#allocation2 + $0x468] ss:$16 sps:$4 sm:$0xff]  }
  0x81   :  { %1336 = vmatpush1.bf16.msra.mxu0 %v2590_v33  ;;  %v2687_v33 = vld [vmem:[#allocation2 + $0x48c] ss:$16 sps:$4 sm:$0xff]  }
  0x82   :  { %1498 = vmatpush1.bf16.msra.mxu1 %v2593_v34  ;;  %1337 = vmatprep.subr.bf16.mxu0 %v2598_v36  ;;  %v2682_v34 = vld [vmem:[#allocation2 + $0x4a0] ss:$16 sps:$4 sm:$0xff]   ;;  %v2690_v36 = vld [vmem:[#allocation2 + $0x4c4] ss:$16 sps:$4 sm:$0xff]  }
  0x83   :  { %1499 = vmatprep.subr.bf16.mxu1 %v2601_v37  ;;  %v2693_v37 = vld [vmem:[#allocation2 + $0x4ac] ss:$16 sps:$4 sm:$0xff]  }
  0x85   :  { %1338 = vmatpush1.bf16.msra.mxu0 %v2596_v38  ;;  %v2688_v38 = vld [vmem:[#allocation2 + $0x4c0] ss:$16 sps:$4 sm:$0xff]  }
  0x86   :  { %1500 = vmatpush1.bf16.msra.mxu1 %v2599_v39  ;;  %1339 = vmatprep.subr.bf16.mxu0 %v2604_v40  ;;  %v2691_v39 = vld [vmem:[#allocation2 + $0x4a8] ss:$16 sps:$4 sm:$0xff]   ;;  %v2696_v40 = vld [vmem:[#allocation2 + $0x4e4] ss:$16 sps:$4 sm:$0xff]  }
  0x87   :  { %1501 = vmatprep.subr.bf16.mxu1 %v2607_v41  ;;  %v2699_v41 = vld [vmem:[#allocation2 + $0x4cc] ss:$16 sps:$4 sm:$0xff]  }
  0x89   :  { %1340 = vmatpush1.bf16.msra.mxu0 %v2602_v42  ;;  %v2694_v42 = vld [vmem:[#allocation2 + $0x4e0] ss:$16 sps:$4 sm:$0xff]  }
  0x8a   :  { %1502 = vmatpush1.bf16.msra.mxu1 %v2605_v43  ;;  %1341 = vmatprep.subr.bf16.mxu0 %v2610_v44  ;;  %v2697_v43 = vld [vmem:[#allocation2 + $0x4c8] ss:$16 sps:$4 sm:$0xff]   ;;  %v2702_v44 = vld [vmem:[#allocation2 + $0x504] ss:$16 sps:$4 sm:$0xff]  }
  0x8b   :  { %1503 = vmatprep.subr.bf16.mxu1 %v2613_v45  ;;  %v2705_v45 = vld [vmem:[#allocation2 + $0x4ec] ss:$16 sps:$4 sm:$0xff]  }
  0x8d   :  { %1342 = vmatpush1.bf16.msra.mxu0 %v2608_v46  ;;  %v2700_v46 = vld [vmem:[#allocation2 + $0x500] ss:$16 sps:$4 sm:$0xff]  }
  0x8e   :  { %1504 = vmatpush1.bf16.msra.mxu1 %v2611_v47  ;;  %1343 = vmatprep.subr.bf16.mxu0 %v2616_v48  ;;  %v2703_v47 = vld [vmem:[#allocation2 + $0x4e8] ss:$16 sps:$4 sm:$0xff]   ;;  %v2708_v48 = vld [vmem:[#allocation2 + $0x524] ss:$16 sps:$4 sm:$0xff]  }
  0x8f   :  { %1505 = vmatprep.subr.bf16.mxu1 %v2619_v49  ;;  %v2711_v49 = vld [vmem:[#allocation2 + $0x50c] ss:$16 sps:$4 sm:$0xff]  }
  0x91   :  { %1344 = vmatpush1.bf16.msra.mxu0 %v2614_v50  ;;  %v2706_v50 = vld [vmem:[#allocation2 + $0x520] ss:$16 sps:$4 sm:$0xff]  }
  0x92   :  { %1506 = vmatpush1.bf16.msra.mxu1 %v2617_v51  ;;  %1345 = vmatprep.subr.bf16.mxu0 %v2622_v52  ;;  %v2709_v51 = vld [vmem:[#allocation2 + $0x508] ss:$16 sps:$4 sm:$0xff]   ;;  %v2714_v52 = vld [vmem:[#allocation2 + $0x544] ss:$16 sps:$4 sm:$0xff]  }
  0x93   :  { %1507 = vmatprep.subr.bf16.mxu1 %v2625_v53  ;;  %v2717_v53 = vld [vmem:[#allocation2 + $0x52c] ss:$16 sps:$4 sm:$0xff]  }
  0x95   :  { %1346 = vmatpush1.bf16.msra.mxu0 %v2620_v54  ;;  %v2712_v54 = vld [vmem:[#allocation2 + $0x540] ss:$16 sps:$4 sm:$0xff]  }
  0x96   :  { %1508 = vmatpush1.bf16.msra.mxu1 %v2623_v55  ;;  %1347 = vmatprep.subr.bf16.mxu0 %v2628_v56  ;;  %v2715_v55 = vld [vmem:[#allocation2 + $0x528] ss:$16 sps:$4 sm:$0xff]   ;;  %v2720_v56 = vld [vmem:[#allocation2 + $0x564] ss:$16 sps:$4 sm:$0xff]  }
  0x97   :  { %1509 = vmatprep.subr.bf16.mxu1 %v2631_v57  ;;  %v2723_v57 = vld [vmem:[#allocation2 + $0x54c] ss:$16 sps:$4 sm:$0xff]  }
  0x99   :  { %1348 = vmatpush1.bf16.msra.mxu0 %v2626_v58  ;;  %v2718_v58 = vld [vmem:[#allocation2 + $0x560] ss:$16 sps:$4 sm:$0xff]  }
  0x9a   :  { %1510 = vmatpush1.bf16.msra.mxu1 %v2629_v59  ;;  %1349 = vmatprep.subr.bf16.mxu0 %v2634_v60  ;;  %v2721_v59 = vld [vmem:[#allocation2 + $0x548] ss:$16 sps:$4 sm:$0xff]   ;;  %v2726_v60 = vld [vmem:[#allocation2 + $0x584] ss:$16 sps:$4 sm:$0xff]  }
  0x9b   :  { %1511 = vmatprep.subr.bf16.mxu1 %v2637_v61  ;;  %v2729_v61 = vld [vmem:[#allocation2 + $0x56c] ss:$16 sps:$4 sm:$0xff]  }
  0x9d   :  { %1350 = vmatpush1.bf16.msra.mxu0 %v2632_v62  ;;  %v2724_v62 = vld [vmem:[#allocation2 + $0x580] ss:$16 sps:$4 sm:$0xff]  }
  0x9e   :  { %1512 = vmatpush1.bf16.msra.mxu1 %v2635_v63  ;;  %1351 = vmatprep.subr.bf16.mxu0 %v2640_v1  ;;  %v2727_v63 = vld [vmem:[#allocation2 + $0x568] ss:$16 sps:$4 sm:$0xff]   ;;  %v2732_v1 = vld [vmem:[#allocation2 + $0x5a4] ss:$16 sps:$4 sm:$0xff]  }
  0x9f   :  { %1513 = vmatprep.subr.bf16.mxu1 %v2643_v2  ;;  %v2735_v2 = vld [vmem:[#allocation2 + $0x58c] ss:$16 sps:$4 sm:$0xff]  }
  0xa1   :  { %1352 = vmatpush1.bf16.msra.mxu0 %v2638_v3  ;;  %v2730_v3 = vld [vmem:[#allocation2 + $0x5a0] ss:$16 sps:$4 sm:$0xff]  }
  0xa2   :  { %1514 = vmatpush1.bf16.msra.mxu1 %v2641_v4  ;;  %1353 = vmatprep.subr.bf16.mxu0 %v2646_v5  ;;  %v2733_v4 = vld [vmem:[#allocation2 + $0x588] ss:$16 sps:$4 sm:$0xff]   ;;  %v2738_v5 = vld [vmem:[#allocation2 + $0x5c4] ss:$16 sps:$4 sm:$0xff]  }
  0xa3   :  { %1515 = vmatprep.subr.bf16.mxu1 %v2649_v6  ;;  %v2741_v6 = vld [vmem:[#allocation2 + $0x5ac] ss:$16 sps:$4 sm:$0xff]  }
  0xa5   :  { %1354 = vmatpush1.bf16.msra.mxu0 %v2644_v7  ;;  %v2736_v7 = vld [vmem:[#allocation2 + $0x5c0] ss:$16 sps:$4 sm:$0xff]  }
  0xa6   :  { %1516 = vmatpush1.bf16.msra.mxu1 %v2647_v8  ;;  %1364 = vmatprep.subr.bf16.mxu0 %v2654_v9  ;;  %v2739_v8 = vld [vmem:[#allocation2 + $0x5a8] ss:$16 sps:$4 sm:$0xff]   ;;  %v2744_v9 = vld [vmem:[#allocation2 + $0x5e4] ss:$16 sps:$4 sm:$0xff]  }
  0xa7   :  { %1517 = vmatprep.subr.bf16.mxu1 %v2657_v10  ;;  %v2747_v10 = vld [vmem:[#allocation2 + $0x5cc] ss:$16 sps:$4 sm:$0xff]  }
  0xa8   :  { %1356 = vmatmul.mubr.bf16.vlgmr.msra.gmra.mrb[0].mxu0 %v2101_v11 }
  0xa9   :  { %1365 = vmatpush1.bf16.msra.mxu0 %v2652_v12  ;;  %1396 = vmatprep.mubr.bf16.mxu0 %v2104_v18  ;;  %v2745_v12 = vld [vmem:[#allocation2 + $0x5c8] ss:$16 sps:$4 sm:$0xff]  }
  0xaa   :  { %1518 = vmatpush1.bf16.msra.mxu1 %v2655_v13  ;;  %1366 = vmatprep.subr.bf16.mxu0 %v2660_v14  ;;  %v2752_v13 = vld [vmem:[#allocation2 + $0x5ec] ss:$16 sps:$4 sm:$0xff]   ;;  %v2756_v14 = vld [vmem:[#allocation5 + $0x40] sm:$0xff]  }
  0xab   :  { %1528 = vmatprep.subr.bf16.mxu1 %v2663_v15  ;;  %v2103_v15 = vcombine.low %v2957_v16, %v2957_v16  ;;  %v2761_v16 = vld [vmem:[#allocation5 + $0x10] sm:$0xff]  }
  0xad   :  { %1520 = vmatmul.mubr.bf16.vlgmr.msra.gmra.mrb[4].mxu1 %v2101_v11  ;;  %1367 = vmatpush1.bf16.msra.mxu0 %v2658_v17  ;;  %v2742_v11 = vld [vmem:[#allocation2 + $0x5e0] ss:$16 sps:$4 sm:$0xff]   ;;  %v2750_v17 = vld [vmem:[#allocation2 + $0x5e8] ss:$16 sps:$4 sm:$0xff]  }
  0xae   :  { %1529 = vmatpush1.bf16.msra.mxu1 %v2661_v19  ;;  %1368 = vmatprep.subr.bf16.mxu0 %v2666_v20  ;;  %v2755_v19 = vld [vmem:[#allocation2 + $0x60c] ss:$16 sps:$4 sm:$0xff]  }
  0xaf   :  { %1530 = vmatprep.subr.bf16.mxu1 %v2669_v21  ;;  %1560 = vmatprep.mubr.bf16.mxu1 %v2104_v18  ;;  %v2757_v18 = vld [vmem:[#allocation5] sm:$0xff]   ;;  %v2758_v20 = vld [vmem:[#allocation5 + $0x48] sm:$0xff]  }
  0xb0   :  { %v2753_v21 = vld [vmem:[#allocation2 + $0x608] ss:$16 sps:$4 sm:$0xff]  }
  0xb1   :  { %1369 = vmatpush1.bf16.msra.mxu0 %v2664_v22  ;;  %v2759_v22 = vld [vmem:[#allocation5 + $0x8] sm:$0xff]  }
  0xb2   :  { %1531 = vmatpush1.bf16.msra.mxu1 %v2667_v23  ;;  %1370 = vmatprep.subr.bf16.mxu0 %v2672_v24  ;;  %v2764_v23 = vld [vmem:[#allocation5 + $0xc0] sm:$0xff]   ;;  %v2760_v24 = vld [vmem:[#allocation5 + $0x50] sm:$0xff]  }
  0xb3   :  { %1532 = vmatprep.subr.bf16.mxu1 %v2675_v25  ;;  %v2762_v25 = vld [vmem:[#allocation5 + $0x58] sm:$0xff]  }
  0xb5   :  { %1371 = vmatpush1.bf16.msra.mxu0 %v2670_v26  ;;  %v2763_v26 = vld [vmem:[#allocation5 + $0x18] sm:$0xff]  }
  0xb6   :  { %1533 = vmatpush1.bf16.msra.mxu1 %v2673_v27  ;;  %1372 = vmatprep.subr.bf16.mxu0 %v2678_v28  ;;  %v2766_v27 = vld [vmem:[#allocation5 + $0x60] sm:$0xff]  }
  0xb7   :  { %1534 = vmatprep.subr.bf16.mxu1 %v2681_v29  ;;  %v2765_v28 = vld [vmem:[#allocation5 + $0x80] sm:$0xff]  }
  0xb8   :  { %v2767_v29 = vld [vmem:[#allocation5 + $0x20] sm:$0xff]  }
  0xb9   :  { %1373 = vmatpush1.bf16.msra.mxu0 %v2676_v30  ;;  %v2768_v30 = vld [vmem:[#allocation5 + $0xc8] sm:$0xff]  }
  0xba   :  { %1535 = vmatpush1.bf16.msra.mxu1 %v2679_v31  ;;  %1374 = vmatprep.subr.bf16.mxu0 %v2684_v32  ;;  %v2770_v31 = vld [vmem:[#allocation5 + $0x68] sm:$0xff]   ;;  %v2800_v32 = vld [vmem:[%s3022_s0 + $0x18] ss:$0 sps:$4 sm:$0xff]  }
  0xbb   :  { %1536 = vmatprep.subr.bf16.mxu1 %v2687_v33 }
  0xbd   :  { %1375 = vmatpush1.bf16.msra.mxu0 %v2682_v34 }
  0xbe   :  { %1537 = vmatpush1.bf16.msra.mxu1 %v2685_v35  ;;  %1376 = vmatprep.subr.bf16.mxu0 %v2690_v36 }
  0xbf   :  { %1538 = vmatprep.subr.bf16.mxu1 %v2693_v37  ;;  %v2771_v37 = vld [vmem:[#allocation5 + $0x28] sm:$0xff]  }
  0xc1   :  { %1377 = vmatpush1.bf16.msra.mxu0 %v2688_v38  ;;  %v2772_v38 = vld [vmem:[#allocation5 + $0xd0] sm:$0xff]  }
  0xc2   :  { %1539 = vmatpush1.bf16.msra.mxu1 %v2691_v39  ;;  %1378 = vmatprep.subr.bf16.mxu0 %v2696_v40  ;;  %v2773_v39 = vld [vmem:[#allocation5 + $0x90] sm:$0xff]  }
  0xc3   :  { %1540 = vmatprep.subr.bf16.mxu1 %v2699_v41  ;;  %v2774_v40 = vld [vmem:[#allocation5 + $0x70] sm:$0xff]  }
  0xc4   :  { %v2775_v41 = vld [vmem:[#allocation5 + $0x30] sm:$0xff]  }
  0xc5   :  { %1379 = vmatpush1.bf16.msra.mxu0 %v2694_v42  ;;  %v2776_v42 = vld [vmem:[#allocation5 + $0xd8] sm:$0xff]  }
  0xc6   :  { %1541 = vmatpush1.bf16.msra.mxu1 %v2697_v43  ;;  %1380 = vmatprep.subr.bf16.mxu0 %v2702_v44  ;;  %v2777_v43 = vld [vmem:[#allocation5 + $0x98] sm:$0xff]  }
  0xc7   :  { %1542 = vmatprep.subr.bf16.mxu1 %v2705_v45  ;;  %v2778_v44 = vld [vmem:[#allocation5 + $0x78] sm:$0xff]  }
  0xc8   :  { %v2779_v45 = vld [vmem:[#allocation5 + $0x38] sm:$0xff]  }
  0xc9   :  { %1381 = vmatpush1.bf16.msra.mxu0 %v2700_v46  ;;  %v2780_v46 = vld [vmem:[#allocation5 + $0xe0] sm:$0xff]  }
  0xca   :  { %1543 = vmatpush1.bf16.msra.mxu1 %v2703_v47  ;;  %1382 = vmatprep.subr.bf16.mxu0 %v2708_v48  ;;  %v2781_v47 = vld [vmem:[#allocation5 + $0xa0] sm:$0xff]   ;;  %v2782_v48 = vld [vmem:[#allocation5 + $0xe8] sm:$0xff]  }
  0xcb   :  { %1544 = vmatprep.subr.bf16.mxu1 %v2711_v49  ;;  %v2783_v49 = vld [vmem:[#allocation5 + $0xa8] sm:$0xff]  }
  0xcd   :  { %1383 = vmatpush1.bf16.msra.mxu0 %v2706_v50  ;;  %v2784_v50 = vld [vmem:[#allocation5 + $0xf0] sm:$0xff]  }
  0xce   :  { %1545 = vmatpush1.bf16.msra.mxu1 %v2709_v51  ;;  %1384 = vmatprep.subr.bf16.mxu0 %v2714_v52  ;;  %v2785_v51 = vld [vmem:[#allocation5 + $0xb0] sm:$0xff]   ;;  %v2786_v52 = vld [vmem:[#allocation5 + $0xf8] sm:$0xff]  }
  0xcf   :  { %1546 = vmatprep.subr.bf16.mxu1 %v2717_v53  ;;  %v2787_v53 = vld [vmem:[#allocation5 + $0xb8] sm:$0xff]  }
  0xd1   :  { %1385 = vmatpush1.bf16.msra.mxu0 %v2712_v54  ;;  %v2880_v54 = vmov 0.0  }
  0xd2   :  { %1547 = vmatpush1.bf16.msra.mxu1 %v2715_v55  ;;  %1386 = vmatprep.subr.bf16.mxu0 %v2720_v56  ;;  %v254_v55 = vlaneseq }
  0xd3   :  { %1548 = vmatprep.subr.bf16.mxu1 %v2723_v57 }
  0xd4   :  { %v255_v56 = vshrl.u32 %v254_v55, 7 }
  0xd5   :  { %1387 = vmatpush1.bf16.msra.mxu0 %v2718_v58  ;;  %v50_v58 = vld [vmem:[%s3026_s4] sm:$0xf] }
  0xd6   :  { %1549 = vmatpush1.bf16.msra.mxu1 %v2721_v59  ;;  %1388 = vmatprep.subr.bf16.mxu0 %v2726_v60  ;;  %v256_v57 = vsub.s32 0, %v255_v56  ;;  %v260_v59 = vsub.s32 1, %v255_v56 }
  0xd7   :  { %1550 = vmatprep.subr.bf16.mxu1 %v2729_v61 }
  0xd8   :  { %v257_v60 = vrot.slane %v50_v58, %v256_v57  ;;  %v261_v61 = vrot.slane %v50_v58, %v260_v59 }
  0xd9   :  { %1389 = vmatpush1.bf16.msra.mxu0 %v2724_v62 }
  0xda   :  { %1551 = vmatpush1.bf16.msra.mxu1 %v2727_v63  ;;  %1390 = vmatprep.subr.bf16.mxu0 %v2732_v1 }
  0xdb   :  { %1552 = vmatprep.subr.bf16.mxu1 %v2735_v2 }
  0xdd   :  { %1391 = vmatpush1.bf16.msra.mxu0 %v2730_v3 }
  0xde   :  { %1553 = vmatpush1.bf16.msra.mxu1 %v2733_v4  ;;  %1392 = vmatprep.subr.bf16.mxu0 %v2738_v5 }
  0xdf   :  { %1554 = vmatprep.subr.bf16.mxu1 %v2741_v6 }
  0xe1   :  { %1393 = vmatpush1.bf16.msra.mxu0 %v2736_v7 }
  0xe2   :  { %1555 = vmatpush1.bf16.msra.mxu1 %v2739_v8  ;;  %1394 = vmatprep.subr.bf16.mxu0 %v2744_v9 }
  0xe3   :  { %1556 = vmatprep.subr.bf16.mxu1 %v2747_v10  ;;  %v2788_v10 = vld [vmem:[%s3025_s3] sm:$0xff]  }
  0xe5   :  { %1395 = vmatpush1.bf16.msra.mxu0 %v2742_v11 }
  0xe6   :  { %1557 = vmatpush1.bf16.msra.mxu1 %v2745_v12  ;;  %2346 = vmatprep.subr.bf16.mxu0 %v2756_v14  ;;  %v264_v12 = vsub.s32 2, %v255_v56  ;;  %v2789_v14 = vld [vmem:[%s3025_s3 + $0x8] sm:$0xff]  }
  0xe7   :  { %1558 = vmatprep.subr.bf16.mxu1 %v2752_v13  ;;  %v268_v13 = vsub.s32 3, %v255_v56 }
  0xe8   :  { %1397 = vmatmul.mubr.bf16.vlgmr.msra.gmra.mrb[0].mxu0 %v2103_v15 }
  0xe9   :  { %2347 = vmatpush3.bf16.msra.mxu0 %v2757_v18 }
  0xea   :  { %1559 = vmatpush1.bf16.msra.mxu1 %v2750_v17  ;;  %2348 = vmatprep.subr.bf16.mxu0 %v2758_v20  ;;  %v269_v17 = vrot.slane %v50_v58, %v268_v13 }
  0xeb   :  { %1569 = vmatprep.subr.bf16.mxu1 %v2755_v19 }
  0xed   :  { %1561 = vmatmul.mubr.bf16.vlgmr.msra.gmra.mrb[4].mxu1 %v2103_v15  ;;  %2349 = vmatpush3.bf16.msra.mxu0 %v2759_v22  ;;  %v265_v15 = vrot.slane %v50_v58, %v264_v12 }
  0xee   :  { %1570 = vmatpush1.bf16.msra.mxu1 %v2753_v21  ;;  %1601 = vmatprep.mubr.bf16.mxu1 %v2879_v0  ;;  %v2769_v0 = vld [vmem:[#allocation5 + $0x88] sm:$0xff]  }
  0xef   :  { %2368 = vmatprep.subr.bf16.mxu1 %v2764_v23  ;;  %2350 = vmatprep.subr.bf16.mxu0 %v2760_v24 }
  0xf1   :  { %2351 = vmatpush3.bf16.msra.mxu0 %v2761_v16 }
  0xf2   :  { %2352 = vmatprep.subr.bf16.mxu0 %v2762_v25 }
  0xf5   :  { %2353 = vmatpush3.bf16.msra.mxu0 %v2763_v26 }
  0xf6   :  { %2354 = vmatprep.subr.bf16.mxu0 %v2766_v27  ;;  %v2790_v27 = vld [vmem:[%s3025_s3 + $0x10] sm:$0xff]  }
  0xf9   :  { %2303 = vmatmul.mubr.msk.bf16.vlgmr.msra.gmra.mrb[4].mxu1 %vm1278_vm0, %v2800_v32  ;;  %2355 = vmatpush3.bf16.msra.mxu0 %v2767_v29  ;;  %v2792_v29 = vld [vmem:[%s3025_s3 + $0x20] sm:$0xff]   ;;  %v2795_v32 = vld [vmem:[%s3025_s3 + $0x38] sm:$0xff]  }
  0xfa   :  { %2369 = vmatpush3.bf16.msra.mxu1 %v2765_v28  ;;  %2356 = vmatprep.subr.bf16.mxu0 %v2770_v31  ;;  %v2791_v28 = vld [vmem:[%s3025_s3 + $0x18] sm:$0xff]   ;;  %v2794_v31 = vld [vmem:[%s3025_s3 + $0x30] sm:$0xff]  }
  0xfb   :  { %2370 = vmatprep.subr.bf16.mxu1 %v2768_v30  ;;  %v2793_v30 = vld [vmem:[%s3025_s3 + $0x28] sm:$0xff]  }
  0xfd   :  { %2357 = vmatpush3.bf16.msra.mxu0 %v2771_v37  ;;  %v2304_v37 = vld [vmem:[%s3026_s4 + $0x4] ss:$0 sm:$0xff] }
  0xfe   :  { %2371 = vmatpush3.bf16.msra.mxu1 %v2769_v0  ;;  %2358 = vmatprep.subr.bf16.mxu0 %v2774_v40 }
  0xff   :  { %2372 = vmatprep.subr.bf16.mxu1 %v2772_v38 }
 0x100   :  { %v1439_v33 = vpop.f32.mrb[0].mxu1 }
 0x101   :  { %v1441_v34 = vpop.f32.mrb[1].mxu1  ;;  %2359 = vmatpush3.bf16.msra.mxu0 %v2775_v41 }
 0x102   :  { %v1443_v35 = vpop.f32.mrb[2].mxu1  ;;  %2373 = vmatpush3.bf16.msra.mxu1 %v2773_v39  ;;  %2360 = vmatprep.subr.bf16.mxu0 %v2778_v44 }
 0x103   :  { %v1444_v36 = vpop.f32.mrb[3].mxu1  ;;  %2374 = vmatprep.subr.bf16.mxu1 %v2776_v42 }
 0x105   :  { %2361 = vmatpush3.bf16.msra.mxu0 %v2779_v45 }
 0x106   :  { %2375 = vmatpush3.bf16.msra.mxu1 %v2777_v43  ;;  %2399 = vmatprep.subr.bf16.mxu0 %v2880_v54 }
 0x107   :  { %2376 = vmatprep.subr.bf16.mxu1 %v2780_v46 }
 0x10a   :  { %2377 = vmatpush3.bf16.msra.mxu1 %v2781_v47  ;;  %v2337_v47 = vld [vmem:[%s3026_s4 + $0x5] ss:$0 sm:$0xff]  ;;  %s2845_s4 = scalar_lea.vmem %s2090_s23, 128 }
 0x10b   :  { %2378 = vmatprep.subr.bf16.mxu1 %v2782_v48  ;;  %p2846_p2 = scmp.ne.s32.totalorder %s2090_s23, %s2845_s4  ;;  %p2851_p4 = scmp.lt.s32.totalorder %s2845_s4, %s2845_s4 }
 0x10d   :  { %p2852_p5 = por %p2851_p4, %p2850_p3 }
 0x10e   :  { %2379 = vmatpush3.bf16.msra.mxu1 %v2783_v49 }
 0x10f   :  { %2380 = vmatprep.subr.bf16.mxu1 %v2784_v50  ;;  %p2853_p6 = pnand %p2852_p5, %p2846_p2 }
 0x112   :  { %2381 = vmatpush3.bf16.msra.mxu1 %v2785_v51 }
 0x113   :  { %2382 = vmatprep.subr.bf16.mxu1 %v2786_v52 }
 0x116   :  { %2383 = vmatpush3.bf16.msra.mxu1 %v2787_v53 }
 0x1bb   :  { %v1398_v62 = vpop.f32.mrb[0].mxu0 }
 0x1bc   :  { %v2419_v63 = vadd.f32 %v1398_v62, %v257_v60  ;;  %v1400_v1 = vpop.f32.mrb[1].mxu0 }
 0x1bd   :  { %v2421_v2 = vadd.f32 %v1400_v1, %v261_v61  ;;  %v1402_v3 = vpop.f32.mrb[2].mxu0 }
 0x1be   :  { %v2420_v4 = vadd.f32 %v2419_v63, %v1439_v33  ;;  %v1403_v5 = vpop.f32.mrb[3].mxu0 }
 0x1bf   :  { %v2422_v6 = vadd.f32 %v2421_v2, %v1441_v34 }
 0x1c0   :  { %v1610_v7 = vmax.f32 %v2420_v4, 0.0 }
 0x1c1   :  { %v1611_v8 = vmax.f32 %v2422_v6, 0.0 }
 0x1c2   :  { %v1614_v11 = vpack.c.bf16 %v1610_v7, %v1610_v7 }
 0x1c3   :  { %v1615_v9 = vpack.c.bf16 %v1611_v8, %v1611_v8 }
 0x1c5   :  { %1912 = vmatprep.mubr.bf16.mxu0 %v1615_v9 }
 0x1c6   :  { %1913 = vmatmul.mubr.bf16.vlgmr.msra.gmra.mrb[4].mxu0 %v1614_v11 }
 0x1c7   :  { %2400 = vmatpush3.bf16.msra.mxu0 %v2788_v10  ;;  %2415 = vmatprep.mubr.msk.bf16.mxu0 %vm2881_vm1, %v2880_v54 }
 0x1c8   :  { %2401 = vmatprep.subr.bf16.mxu0 %v2880_v54 }
 0x1cb   :  { %2402 = vmatpush3.bf16.msra.mxu0 %v2789_v14 }
 0x1cc   :  { %v1603_v18 = vpop.f32.mrb[4].mxu1  ;;  %2403 = vmatprep.subr.bf16.mxu0 %v2880_v54 }
 0x1cd   :  { %v2423_v19 = vadd.f32 %v1603_v18, %v265_v15  ;;  %v1605_v20 = vpop.f32.mrb[5].mxu1 }
 0x1ce   :  { %v2424_v21 = vadd.f32 %v1605_v20, %v269_v17  ;;  %v1607_v22 = vpop.f32.mrb[6].mxu1 }
 0x1cf   :  { %v1612_v23 = vmax.f32 %v2423_v19, 0.0  ;;  %v1608_v24 = vpop.f32.mrb[7].mxu1  ;;  %2404 = vmatpush3.bf16.msra.mxu0 %v2790_v27 }
 0x1d0   :  { %v1613_v16 = vmax.f32 %v2424_v21, 0.0  ;;  %2405 = vmatprep.subr.bf16.mxu0 %v2880_v54 }
 0x1d1   :  { %v1616_v26 = vpack.c.bf16 %v1612_v23, %v1612_v23 }
 0x1d2   :  { %v1617_v25 = vpack.c.bf16 %v1613_v16, %v1613_v16 }
 0x1d3   :  { %2406 = vmatpush3.bf16.msra.mxu0 %v2791_v28 }
 0x1d4   :  { %1952 = vmatprep.mubr.bf16.mxu1 %v1617_v25  ;;  %2407 = vmatprep.subr.bf16.mxu0 %v2880_v54 }
 0x1d5   :  { %1953 = vmatmul.mubr.bf16.vlgmr.msra.gmra.mrb[8].mxu1 %v1616_v26 }
 0x1d7   :  { %2408 = vmatpush3.bf16.msra.mxu0 %v2792_v29 }
 0x1d8   :  { %2409 = vmatprep.subr.bf16.mxu0 %v2880_v54 }
 0x1db   :  { %2410 = vmatpush3.bf16.msra.mxu0 %v2793_v30 }
 0x1dc   :  { %2411 = vmatprep.subr.bf16.mxu0 %v2880_v54 }
 0x1df   :  { %2412 = vmatpush3.bf16.msra.mxu0 %v2794_v31 }
 0x1e0   :  { %2413 = vmatprep.subr.bf16.mxu0 %v2880_v54 }
 0x1e3   :  { %2414 = vmatpush3.bf16.msra.mxu0 %v2795_v32 }
 0x299   :  { %v2362_v0 = vpop.f32.mrb[4].mxu0 }
 0x29a   :  { %v2363_v33 = vpop.f32.mrb[5].mxu0 }
 0x29b   :  { %v2364_v34 = vadd.f32 %v2363_v33, %v2362_v0  ;;  %v2365_v35 = vpop.f32.mrb[6].mxu0 }
 0x29c   :  { %v2366_v36 = vpop.f32.mrb[7].mxu0 }
 0x29d   :  { %v1915_v40 = vadd.f32 %v2364_v34, %v2304_v37 }
 0x2a8   :  { %v2384_v38 = vpop.f32.mrb[8].mxu1 }
 0x2a9   :  { %v2385_v39 = vpop.f32.mrb[9].mxu1 }
 0x2aa   :  { %v2386_v41 = vadd.f32 %v2385_v39, %v2384_v38  ;;  %v2387_v42 = vpop.f32.mrb[10].mxu1 }
 0x2ab   :  { %v2388_v43 = vpop.f32.mrb[11].mxu1 }
 0x2ac   :  { %v1955_v44 = vadd.f32 %v2386_v41, %v1915_v40 }
 0x2ae   :  { %v1960_v45 = vmax.f32 %v1955_v44, 0.0 }
 0x2b0   :  { %v1961_v46 = vpack.c.bf16 %v1960_v45, %v1960_v45 }
 0x2b2   :  { %2416 = vmatmul.mubr.bf16.vlgmr.msra.gmra.mrb[8].mxu0 %v1961_v46 }
 0x385   :  { %v2066_v48 = vpop.f32.mrb[8].mxu0 }
 0x386   :  { %v2067_v49 = vadd.f32 %v2337_v47, %v2066_v48  ;;  %v2417_v50 = vpop.f32.mrb[9].mxu0 }
 0x387   :  { %v2069_v51 = vpop.f32.mrb[10].mxu0 }
 0x388   :  { %2072 = vmax.xlane.f32.xlu0 %v2067_v49  ;;  %v2418_v52 = vpop.f32.mrb[11].mxu0 }
 0x415   :  { %v2073_v53 = vpop.xlane.xlu0 %2072 }
 0x416   :  { %v2074_v54 = vsub.f32 %v2067_v49, %v2073_v53 }
 0x418   :  { %v2075_v55 = vmul.f32 1.442695, %v2074_v54 }
 0x41a   :  { %2796 = vpow2.f32 %v2075_v55 }
 0x424   :  { %v2797_v56 = vpop.eup %2796 }
 0x425   :  { %2077 = vadd.xlane.f32.xlu0 %v2797_v56 }
 0x4b2   :  { %v2078_v57 = vpop.xlane.xlu0 %2077 }
 0x4b3   :  { %2798 = vlog2.f32 %v2078_v57 }
 0x4bd   :  { %v2799_v58 = vpop.eup %2798 }
 0x4be   :  { %v2080_v59 = vmul.f32 0.6931472, %v2799_v58 }
 0x4c0   :  { %v2081_v60 = vsub.f32 %v2074_v54, %v2080_v59 }
 0x4c2   :  { %2082 = vst [vmem:[#allocation7] sm:$0xff] %v2081_v60 }
 0x4c3   :  { %2856 = shalt.err (!%p2853_p6)
}
 0x4c4   :  { %s2857_s26 = scalar_lea.hbm %s3027_s5, 128 }
 0x4c5   :  { %p2858_p7 = scmp.ne.s32.totalorder %s3027_s5, %s2857_s26  ;;  %p2861_p8 = scmp.lt.u32.totalorder %s2857_s26, %s3027_s5 }
 0x4c7   :  { %p2863_p9 = pnand %p2861_p8, %p2858_p7 }
 0x4c9   :  { %2866 = shalt.err (!%p2863_p9)
}
 0x4ca   :  { %2092 = dma.vmem_to_hbm [thread:$0]  %s2090_s23, 128, %s3027_s5, [#allocation4]  }
 0x4cb   :  { %2871 = dma.done.wait [#allocation4], 128  }
 0x4cc   :  { %2872 = vsyncadd [#allocation4], 4294967168 }
 0x4cd   :  { %2096 = vsyncpa [#allocation3], 1 }
 0x4ce   :  { %2097 = vsyncpa [#allocation6], 1 }
 0x4cf   :  { %2098 = vsyncpa [#allocation4], 1 }

</bundles_post_ra>
